<compile_context>
chip_gen: v5e
topology: v5e:2x2
jax: 0.10.0
libtpu: 0.0.40
codegen_flags: <defaults>
</compile_context>

<pallas_src>
import jax
import jax.numpy as jnp
from jax.experimental import pallas as pl
from jax.experimental.pallas import tpu as pltpu


# ---------------------------------------------------------------------------
# Fused single-pass kernel: squeeze + excite + scale, Bt batch rows per step.
# ---------------------------------------------------------------------------
def _se_fused_kernel(x_ref, w1_ref, w2_ref, o_ref):
    # x_ref : (Bt, C, HW)  current batch tile, native dtype
    # w1_ref: (C, Cr)      fc1.weight.T   (Linear(C -> C//r, bias=False))
    # w2_ref: (Cr, C)      fc2.weight.T   (Linear(C//r -> C, bias=False))
    # o_ref : (Bt, C, HW)
    x = x_ref[...]                                             # native dtype
    hw = x.shape[-1]

    # Squeeze: global average pool over spatial dims, f32 accumulation.
    y = jnp.sum(x.astype(jnp.float32), axis=2) * (1.0 / hw)    # (Bt, C) f32

    # Excitation: Linear -> ReLU -> Linear -> Sigmoid (f32, tiny FLOPs).
    h = jnp.dot(y, w1_ref[...].astype(jnp.float32),
                preferred_element_type=jnp.float32)            # (Bt, Cr)
    h = jnp.maximum(h, 0.0)
    s = jnp.dot(h, w2_ref[...].astype(jnp.float32),
                preferred_element_type=jnp.float32)            # (Bt, C)
    s = jax.nn.sigmoid(s)

    # Scale: keep the big elementwise pass in the input dtype (bf16-friendly).
    o_ref[...] = (x * s.astype(x.dtype)[:, :, None]).astype(o_ref.dtype)


# ---------------------------------------------------------------------------
# Fallback scale-only kernel (used when a full (1, C, HW) block is too big).
# ---------------------------------------------------------------------------
def _se_scale_kernel(x_ref, s_ref, o_ref):
    # x_ref: (1, Ct, HW); s_ref: (1, Ct, 1); o_ref: (1, Ct, HW)
    o_ref[...] = (x_ref[...] * s_ref[...].astype(x_ref.dtype)).astype(o_ref.dtype)


# ---------------------------------------------------------------------------
# Sizing helpers.
# ---------------------------------------------------------------------------
def _device_vmem_budget_bytes():
    """Half of physical VMEM per TensorCore as the scoped budget."""
    try:
        info = pltpu.get_tpu_info()
        phys = int(getattr(info, "vmem_capacity_bytes", 0))
        if phys > 0:
            return phys // 2
    except Exception:
        pass
    return 32 * 1024 * 1024  # conservative default (v7x scoped default)


def _choose_bt(B, per_elem_bytes, weight_bytes, budget_bytes):
    """Largest batch-tile (divisor of B) fitting the VMEM budget.

    Footprint model: 2x double-buffered input + 2x output blocks + one live
    f32 temp (~5 blocks) + the (double-buffered) weight matrices + headroom.
    """
    headroom = min(budget_bytes // 8, 1 << 20)
    avail = budget_bytes - 2 * weight_bytes - headroom
    if per_elem_bytes <= 0 or avail <= 0:
        return 0
    max_bt = min(B, avail // (5 * per_elem_bytes))
    if max_bt < 1:
        return 0
    divisors = [d for d in range(1, int(max_bt) + 1) if B % d == 0]
    # Prefer >= 2 grid steps (v7x megacore) when the batch allows it.
    multi_step = [d for d in divisors if B // d >= 2]
    return max(multi_step) if multi_step else max(divisors)


# ---------------------------------------------------------------------------
# Wrapper.
# ---------------------------------------------------------------------------
def se_layer(x, w1, w2, *, block_budget_bytes=None):
    """SELayer forward.  x: (B, C, H, W); w1: (Cr, C); w2: (C, Cr)."""
    B, C, H, W = x.shape
    HW = H * W
    x_flat = x.reshape(B, C, HW)
    w1_t = jnp.transpose(w1)   # (C, Cr)
    w2_t = jnp.transpose(w2)   # (Cr, C)
    Cr = w1_t.shape[1]

    device_budget = _device_vmem_budget_bytes()
    block_budget = block_budget_bytes or device_budget
    itemsize = x.dtype.itemsize
    per_elem = C * HW * itemsize
    weight_bytes = (w1_t.size * w1_t.dtype.itemsize
                    + w2_t.size * w2_t.dtype.itemsize)

    bt = _choose_bt(B, per_elem, weight_bytes, block_budget)

    if bt >= 1:
        out = pl.pallas_call(
            _se_fused_kernel,
            out_shape=jax.ShapeDtypeStruct((B, C, HW), x.dtype),
            grid_spec=pltpu.PrefetchScalarGridSpec(
                num_scalar_prefetch=0,
                grid=(B // bt,),
                in_specs=[
                    pl.BlockSpec((bt, C, HW), lambda b: (b, 0, 0)),
                    pl.BlockSpec((C, Cr), lambda b: (0, 0)),
                    pl.BlockSpec((Cr, C), lambda b: (0, 0)),
                ],
                out_specs=pl.BlockSpec((bt, C, HW), lambda b: (b, 0, 0)),
            ),
            compiler_params=pltpu.CompilerParams(
                dimension_semantics=("parallel",),
                vmem_limit_bytes=device_budget),
        )(x_flat, w1_t, w2_t)
        return out.reshape(B, C, H, W)

    # ---- Fallback: a Bt=1 block exceeds the VMEM budget.  Pooled scales via
    # a plain XLA reduce (tiny compute; ~1x extra read of x), then a Pallas
    # scale-multiply kernel tiled over channel chunks.  The last (lane) dim
    # stays the full HW; the channel chunk is a multiple of 8.
    y = jnp.mean(x_flat.astype(jnp.float32), axis=2)           # (B, C)
    h = jnp.maximum(y @ w1_t.astype(jnp.float32), 0.0)         # (B, Cr)
    s = jax.nn.sigmoid(h @ w2_t.astype(jnp.float32))           # (B, C)
    s3 = s.reshape(B, C, 1)

    headroom = min(block_budget // 8, 1 << 20)
    candidates = [d for d in range(8, C + 1, 8)
                  if C % d == 0 and 5 * d * HW * itemsize <= block_budget - headroom]
    ct = max(candidates) if candidates else C

    out = pl.pallas_call(
        _se_scale_kernel,
        out_shape=jax.ShapeDtypeStruct((B, C, HW), x.dtype),
        grid_spec=pltpu.PrefetchScalarGridSpec(
            num_scalar_prefetch=0,
            grid=(B, C // ct),
            in_specs=[
                pl.BlockSpec((1, ct, HW), lambda b, c: (b, c, 0)),
                pl.BlockSpec((1, ct, 1), lambda b, c: (b, c, 0)),
            ],
            out_specs=pl.BlockSpec((1, ct, HW), lambda b, c: (b, c, 0)),
        ),
        compiler_params=pltpu.CompilerParams(
            dimension_semantics=("parallel", "parallel"),
            vmem_limit_bytes=device_budget),
    )(x_flat, s3)
    return out.reshape(B, C, H, W)


def se_layer_ref(x, w1, w2):
    """Pure-JAX reference mirroring the PyTorch forward."""
    y = jnp.mean(x.astype(jnp.float32), axis=(2, 3))           # (B, C)
    y = jnp.maximum(y @ w1.T.astype(jnp.float32), 0.0)         # (B, Cr)
    y = jax.nn.sigmoid(y @ w2.T.astype(jnp.float32))           # (B, C)
    return x.astype(jnp.float32) * y[:, :, None, None]


if __name__ == "__main__":
    B, C, H, W = 4, 32, 16, 16
    reduction = 16
    Cr = C // reduction

    key = jax.random.PRNGKey(0)
    kx, k1, k2 = jax.random.split(key, 3)

    x = jax.random.normal(kx, (B, C, H, W), dtype=jnp.float32)
    # PyTorch Linear weight shape = (out_features, in_features).
    b1 = 1.0 / jnp.sqrt(C)
    b2 = 1.0 / jnp.sqrt(Cr)
    w1 = jax.random.uniform(k1, (Cr, C), minval=-b1, maxval=b1, dtype=jnp.float32)
    w2 = jax.random.uniform(k2, (C, Cr), minval=-b2, maxval=b2, dtype=jnp.float32)

    ref = jax.block_until_ready(se_layer_ref(x, w1, w2))

    # Primary fused path (Bt=2 here -> 2 grid steps).
    out = jax.block_until_ready(se_layer(x, w1, w2))
    assert out.shape == (B, C, H, W)
    assert jnp.allclose(out, ref, atol=1e-5, rtol=1e-5)

    # bf16 activations: mean/excitation accumulate in f32, scale stays bf16.
    x_bf16 = x.astype(jnp.bfloat16)
    out_bf16 = jax.block_until_ready(se_layer(x_bf16, w1, w2))
    ref_bf16 = se_layer_ref(x_bf16.astype(jnp.float32), w1, w2)
    assert out_bf16.dtype == jnp.bfloat16
    assert jnp.allclose(out_bf16.astype(jnp.float32), ref_bf16, atol=2e-2, rtol=2e-2)

    # Force the two-pass fallback (tiny block budget) to exercise it as well.
    out_fb = jax.block_until_ready(se_layer(x, w1, w2, block_budget_bytes=96 * 1024))
    assert jnp.allclose(out_fb, ref, atol=1e-5, rtol=1e-5)

    print("KERNEL_OK")
</pallas_src>

<mosaic_0001>
module attributes {stable_mosaic.version = 11 : i64} {
  func.func @_se_fused_kernel(%arg0: i32, %arg1: memref<2x32x256xf32, #tpu.memory_space<vmem>>, %arg2: memref<32x2xf32, #tpu.memory_space<vmem>>, %arg3: memref<2x32xf32, #tpu.memory_space<vmem>>, %arg4: memref<2x32x256xf32, #tpu.memory_space<vmem>>) attributes {dimension_semantics = [#tpu.dimension_semantics<parallel>], iteration_bounds = array<i64: 2>, scalar_prefetch = 0 : i64, scratch_operands = 0 : i64, tpu.core_type = #tpu.core_type<tc>, window_params = [{transform_indices = @transform_0, window_bounds = array<i64: 2, 32, 256>}, {pipeline_mode = #tpu.pipeline_mode<synchronous>, transform_indices = @transform_1, window_bounds = array<i64: 32, 2>}, {pipeline_mode = #tpu.pipeline_mode<synchronous>, transform_indices = @transform_2, window_bounds = array<i64: 2, 32>}, {transform_indices = @transform_3, window_bounds = array<i64: 2, 32, 256>}]} {
    %c0 = arith.constant 0 : index
    %c0_0 = arith.constant 0 : index
    %c0_1 = arith.constant 0 : index
    %0 = vector.load %arg1[%c0, %c0_0, %c0_1] : memref<2x32x256xf32, #tpu.memory_space<vmem>>, vector<2x32x256xf32>
    %cst = arith.constant dense<0.000000e+00> : vector<2x32xf32>
    %1 = vector.multi_reduction <add>, %0, %cst [2] : vector<2x32x256xf32> to vector<2x32xf32>
    %cst_2 = arith.constant 3.906250e-03 : f32
    %2 = vector.broadcast %cst_2 : f32 to vector<2x32xf32>
    %3 = arith.mulf %1, %2 : vector<2x32xf32>
    %c0_3 = arith.constant 0 : index
    %c0_4 = arith.constant 0 : index
    %4 = vector.load %arg2[%c0_3, %c0_4] : memref<32x2xf32, #tpu.memory_space<vmem>>, vector<32x2xf32>
    %cst_5 = arith.constant dense<0.000000e+00> : vector<2x2xf32>
    %5 = tpu.matmul %3, %4, %cst_5 {dimension_numbers = #tpu.dot_dimension_numbers<[1], [0], [0], [1], [0, 0, 1, 1], [], []>} : vector<2x32xf32>, vector<32x2xf32>, vector<2x2xf32> -> vector<2x2xf32>
    %cst_6 = arith.constant 0.000000e+00 : f32
    %6 = vector.broadcast %cst_6 : f32 to vector<2x2xf32>
    %7 = arith.maximumf %5, %6 : vector<2x2xf32>
    %c0_7 = arith.constant 0 : index
    %c0_8 = arith.constant 0 : index
    %8 = vector.load %arg3[%c0_7, %c0_8] : memref<2x32xf32, #tpu.memory_space<vmem>>, vector<2x32xf32>
    %cst_9 = arith.constant dense<0.000000e+00> : vector<2x32xf32>
    %9 = tpu.matmul %7, %8, %cst_9 {dimension_numbers = #tpu.dot_dimension_numbers<[1], [0], [0], [1], [0, 0, 1, 1], [], []>} : vector<2x2xf32>, vector<2x32xf32>, vector<2x32xf32> -> vector<2x32xf32>
    %10 = arith.negf %9 : vector<2x32xf32>
    %11 = math.exp %10 : vector<2x32xf32>
    %cst_10 = arith.constant 1.000000e+00 : f32
    %12 = vector.broadcast %cst_10 : f32 to vector<2x32xf32>
    %13 = arith.addf %12, %11 : vector<2x32xf32>
    %14 = arith.divf %12, %13 : vector<2x32xf32>
    %15 = vector.shape_cast %14 : vector<2x32xf32> to vector<2x32x1xf32>
    %16 = vector.broadcast %15 : vector<2x32x1xf32> to vector<2x32x256xf32>
    %17 = arith.mulf %0, %16 : vector<2x32x256xf32>
    %c0_11 = arith.constant 0 : index
    %c0_12 = arith.constant 0 : index
    %c0_13 = arith.constant 0 : index
    %18 = vector.load %arg4[%c0_11, %c0_12, %c0_13] : memref<2x32x256xf32, #tpu.memory_space<vmem>>, vector<2x32x256xf32>
    tpu.vector_store %arg4[%c0_11, %c0_12, %c0_13], %17 {strides = array<i32>} : memref<2x32x256xf32, #tpu.memory_space<vmem>>, vector<2x32x256xf32>,
    return
  }
  func.func @transform_0(%arg0: i32) -> (i32, i32, i32) {
    %c0_i32 = arith.constant 0 : i32
    %c0_i32_0 = arith.constant 0 : i32
    %c0_i32_1 = arith.constant 0 : i32
    return %arg0, %c0_i32, %c0_i32_0 : i32, i32, i32
  }
  func.func @transform_1(%arg0: i32) -> (i32, i32) {
    %c0_i32 = arith.constant 0 : i32
    %c0_i32_0 = arith.constant 0 : i32
    %c0_i32_1 = arith.constant 0 : i32
    return %c0_i32, %c0_i32_0 : i32, i32
  }
  func.func @transform_2(%arg0: i32) -> (i32, i32) {
    %c0_i32 = arith.constant 0 : i32
    %c0_i32_0 = arith.constant 0 : i32
    %c0_i32_1 = arith.constant 0 : i32
    return %c0_i32, %c0_i32_0 : i32, i32
  }
  func.func @transform_3(%arg0: i32) -> (i32, i32, i32) {
    %c0_i32 = arith.constant 0 : i32
    %c0_i32_0 = arith.constant 0 : i32
    %c0_i32_1 = arith.constant 0 : i32
    return %arg0, %c0_i32, %c0_i32_0 : i32, i32, i32
  }
}

</mosaic_0001>

<bundles_post_ra>
// kernel: tpu_custom_call.1
= control target key start
LH: loop header
LB: loop body
LE: loop exit
PB: predicated region body
PF: predicated region fallthrough
CT: control target
= control target key end

     0   :  { %8 = vsyncpa [#allocation3], 0  ;;  %s960_s0 = inlined_call_operand.hbm [shape: f32[4,32,256], index: 0, kind: input, shape index: {}]   ;;  %s961_s1 = inlined_call_operand.vmem [shape: f32[32,2], index: 1, kind: input, shape index: {}]   ;;  %s962_s2 = inlined_call_operand.vmem [shape: f32[2,32], index: 2, kind: input, shape index: {}]   ;;  %s963_s3 = inlined_call_operand.hbm [shape: f32[4,32,256], index: 3, kind: output, shape index: {}]  }
   0x1   :  { %10 = vsyncpa [#allocation3 + $0x1], 0 }
   0x2   :  { %11 = vsyncpa [#allocation4], 0 }
   0x3   :  { %13 = vsyncpa [#allocation4 + $0x1], 0  ;;  %s731_s12 = smov 0   ;;  %s733_s13 = smov 0  }
   0x4   :  { %s735_s14 = smov 0   ;;  %s737_s15 = smov 0  }
   0x5 LB: > { %s752_s16 = sadd.s32 4294967295, %s705_s15   ;;  %s522_s17 = sadd.s32 4294967294, %s705_s15   ;;  %s705_s15 = sphi %s737_s15, %s973_s15   ;;  %s701_s14 = sphi %s735_s14, %s972_s14   ;;  %s697_s13 = sphi %s733_s13, %s971_s13   ;;  %s693_s12 = sphi %s731_s12, %s970_s12  }
   0x6   : > { %s756_s18 = sadd.s32 1, %s705_s15   ;;  %s26_s19 = sadd.s32 1, %s701_s14 }
   0x7   : > { %s23_s20 = ssub.s32 %s705_s15, %s756_s18  ;;  %p33_p0 = scmp.ne.s32.totalorder %s701_s14, %s697_s13 }
   0x8   : > { %p24_p1 = scmp.eq.s32.totalorder %s23_s20, 0  ;;  %p34_p2 = scmp.eq.s32.totalorder %s705_s15, 0 }
   0x9   : > { %p39_p3 = scmp.ne.s32.totalorder %s697_s13, %s693_s12  ;;  %p40_p4 = scmp.eq.s32.totalorder %s752_s16, 0 }
   0xa   : > { %s768_s21 = scalar_select %p24_p1, %s701_s14, %s26_s19  }
   0xb   : > { %p770_p5 = por %p34_p2, %p33_p0  ;;  %p774_p6 = por %p40_p4, %p39_p3 }
   0xc   : > { %p105_p7 = scmp.eq.s32.totalorder %s752_s16, 1  ;;  %p111_p8 = scmp.eq.s32.totalorder %s522_s17, 1 }
   0xd   : > { %p558_p10 = scmp.lt.s32.totalorder %s705_s15, 2  ;;  %s137_s26 = sand.u32 1, %s701_s14  }
   0xe   : > { %p781_p11 = por %p105_p7, %p33_p0  ;;  %p785_p12 = por %p111_p8, %p39_p3 }
   0xf   : > { %s543_s27 = sshll.u32 %s705_s15, 7  ;;  %s525_s28 = sshll.u32 %s137_s26, 7 }
  0x10   : > { %s147_s4 = scalar_lea.hbm %s960_s0, %s543_s27  ;;  %s141_s6 = scalar_lea.vmem [#allocation2], %s525_s28 }
  0x11   : > { %s148_s5 = sshll.u32 %s147_s4, 4  ;;  %s150_s7 = sshll.u32 %s141_s6, 4  ;;  %s149_s5 = int_to_ptr.hbm [resolvable:$true] %s148_s5  ;;  %s151_s7 = int_to_ptr.vmem [resolvable:$true] %s150_s7 }
  0x12   : > { %p796_p13 = pnand %p558_p10, %p770_p5  ;;  %p529_p0 = scmp.ge.s32.totalorder %s705_s15, 1 }
  0x13   : > { %p158_p1 = scmp.lt.s32.totalorder %s705_s15, 3  ;;  %s138_s9 = scalar_lea.sflag [#allocation3], %s137_s26 }
  0x14   : > { %s609_s10 = sshra.s32 %s149_s5, 4  ;;  %p613_p3 = pneg %p796_p13  ;;  %s610_s10 = int_to_ptr.hbm [resolvable:$true] %s609_s10 }
  0x15   : > { %s611_s11 = scalar_lea.hbm %s610_s10, 128  ;;  %s616_s20 = scalar_lea.hbm %s960_s0, 256 }
  0x16   : > { %p612_p2 = scmp.ne.s32.totalorder %s610_s10, %s611_s11  ;;  %p617_p5 = scmp.lt.s32.totalorder %s610_s10, %s960_s0 }
  0x17   : > { %p618_p8 = scmp.lt.s32.totalorder %s616_s20, %s611_s11 }
  0x18   : > { %p614_p4 = pnand %p613_p3, %p612_p2 }
  0x19   : > { %p619_p10 = por %p618_p8, %p617_p5 }
  0x1a   : > { %p615_p7 = pneg %p614_p4 }
  0x1c   : > { %p620_p9 = pnand %p619_p10, %p615_p7 }
  0x1e   : > { %623 = shalt.err (!%p620_p9)
}
  0x1f   : > { %s707_s26 = smov 256   ;;  %s708_s28 = smov 16  }
  0x20   : > { %553 = dma.hbm_to_vmem [thread:$0]  (!%p796_p13), %s149_s5, 2048, %s151_s7, %s138_s9, %s707_s26, %s707_s26, %s708_s28  }
  0x21   : > { %p159_p2 = pnand %p529_p0, %p158_p1 }
  0x22   : > { %s817_s29 = sand.u32 (!%p159_p2), 1, %s697_s13  }
  0x23   : > { %162 = sbr.rel (%p159_p2) target bundleno = 621 (0x26d), region = 32  ;;  %s530_s30 = sshll.u32 (!%p159_p2), %s817_s29, 7 }
  0x24   : > { %s165_s4 = scalar_lea.sflag (!%p159_p2), [#allocation3], %s817_s29  ;;  %s168_s6 = scalar_lea.vmem (!%p159_p2), [#allocation2], %s530_s30 }
  0x28   : > { %684 = dma.done.wait (%p774_p6), %s165_s4, 2048  }
  0x29   : > { %686 = vsyncadd (%p774_p6), %s165_s4, 4294965248  ;;  %v827_v0 = vld [vmem:[%s168_s6 + $0x40] sm:$0xff]  ;;  %v829_v1 = vld [vmem:[%s168_s6 + $0x48] sm:$0xff]  ;;  %v254_v31 = vlaneseq  ;;  %vm259_vm0 = vcmask 130112   ;;  %vm263_vm1 = vcmask 195712   ;;  %vm267_vm2 = vcmask 261312  }
  0x2a   : > { %v831_v2 = vld [vmem:[%s168_s6] sm:$0xff]  ;;  %v222_v3 = vadd.f32 %v829_v1, %v827_v0  ;;  %v835_v4 = vld [vmem:[%s168_s6 + $0x8] sm:$0xff]  ;;  %v845_v9 = vld [vmem:[%s168_s6 + $0x50] sm:$0xff]  ;;  %vm276_vm3 = vcmask 1041409   ;;  %vm278_vm4 = vcmask 261120   ;;  %vm307_vm5 = vcmask 1041408  }
  0x2b   : > { %v837_v5 = vld [vmem:[%s168_s6 + $0x20] sm:$0xff]  ;;  %v839_v6 = vld [vmem:[%s168_s6 + $0x28] sm:$0xff]  ;;  %v210_v7 = vadd.f32 %v835_v4, %v831_v2  ;;  %v847_v10 = vld [vmem:[%s168_s6 + $0x58] sm:$0xff]  ;;  %v255_v32 = vand.u32 127, %v254_v31  ;;  %vm303_vm6 = vcmask 15360   ;;  %s894_s22 = scalar_lea.vmem [#allocation5], %s530_s30 }
  0x2c   : > { %v216_v8 = vadd.f32 %v839_v6, %v837_v5  ;;  %223 = vadd.xlane.f32.xlu1 %v222_v3  ;;  %v849_v11 = vld [vmem:[%s168_s6 + $0x10] sm:$0xff]  ;;  %v851_v12 = vld [vmem:[%s168_s6 + $0x18] sm:$0xff]  ;;  %v853_v13 = vld [vmem:[%s168_s6 + $0x60] sm:$0xff]  ;;  %v225_v15 = vadd.f32 %v847_v10, %v845_v9  ;;  %s545_s27 = sshll.u32 %s752_s16, 7  ;;  %s446_s4 = sshll.u32 %s894_s22, 4  ;;  %s447_s4 = int_to_ptr.vmem [resolvable:$true] %s446_s4 }
  0x2d   : > { %211 = vadd.xlane.f32.xlu0 %v210_v7  ;;  %v855_v14 = vld [vmem:[%s168_s6 + $0x68] sm:$0xff]  ;;  %v213_v16 = vadd.f32 %v851_v12, %v849_v11  ;;  %v863_v18 = vld [vmem:[%s168_s6 + $0x70] sm:$0xff]  ;;  %v865_v19 = vld [vmem:[%s168_s6 + $0x78] sm:$0xff]  ;;  %v257_v34 = vadd.s32 4294967288, %v255_v32  ;;  %v261_v43 = vadd.s32 4294967280, %v255_v32  ;;  %v265_v47 = vadd.s32 4294967272, %v255_v32  ;;  %s445_s30 = scalar_lea.hbm %s963_s3, %s545_s27 }
  0x2e   : > { %217 = vadd.xlane.f32.xlu2 %v216_v8  ;;  %v228_v17 = vadd.f32 %v855_v14, %v853_v13  ;;  %v867_v20 = vld [vmem:[%s168_s6 + $0x30] sm:$0xff]  ;;  %v869_v21 = vld [vmem:[%s168_s6 + $0x38] sm:$0xff]  ;;  %v231_v22 = vadd.f32 %v865_v19, %v863_v18  ;;  %v243_v26 = vld [vmem:[%s961_s1 + $0x8] sm:$0xff]  ;;  %s448_s6 = sshll.u32 %s445_s30, 4  ;;  %s433_s16 = scalar_lea.sflag [#allocation4], %s817_s29  ;;  %s449_s6 = int_to_ptr.hbm [resolvable:$true] %s448_s6 }
  0x2f   : > { %v219_v23 = vadd.f32 %v869_v21, %v867_v20  ;;  %v245_v24 = vld [vmem:[%s961_s1 + $0x18] sm:$0xff]  ;;  %v244_v25 = vld [vmem:[%s961_s1 + $0x10] sm:$0xff]  ;;  %v242_v27 = vld [vmem:[%s961_s1] sm:$0xff]  ;;  %s653_s23 = sshra.s32 %s449_s6, 4  ;;  %s659_s9 = scalar_lea.hbm %s963_s3, 256  ;;  %s654_s23 = int_to_ptr.hbm [resolvable:$true] %s653_s23 }
  0x30   : > { %293 = vmatpush.msra.mxu0 %v245_v24  ;;  %v302_v3 = vld [vmem:[%s962_s2] sm:$0x3]  ;;  %s655_s5 = scalar_lea.hbm %s654_s23, 128  ;;  %p660_p0 = scmp.lt.s32.totalorder %s654_s23, %s963_s3 }
  0x31   : > { %533 = vmatpush.msk.msra.mxu1 %vm307_vm5, %v302_v3  ;;  %p656_p6 = scmp.ne.s32.totalorder %s654_s23, %s655_s5  ;;  %p661_p1 = scmp.lt.s32.totalorder %s659_s9, %s655_s5 }
  0x32   : > { %294 = vmatpush.msra.mxu0 %v244_v25 }
  0x33   : > { %p657_p9 = pnand %p656_p6, %p781_p11  ;;  %p662_p3 = por %p661_p1, %p660_p0 }
  0x34   : > { %226 = vadd.xlane.f32.xlu1 %v225_v15  ;;  %295 = vmatpush.msra.mxu0 %v243_v26  ;;  %v352_v15 = vshrl.u32 %v254_v31, 7 }
  0x35   : > { %214 = vadd.xlane.f32.xlu0 %v213_v16  ;;  %p658_p13 = pneg %p657_p9 }
  0x36   : > { %229 = vadd.xlane.f32.xlu2 %v228_v17  ;;  %296 = vmatpush.msra.mxu0 %v242_v27  ;;  %v365_v16 = vadd.s32 16, %v352_v15  ;;  %v359_v17 = vadd.s32 8, %v352_v15 }
  0x37   : > { %596 = vset.pattern.permute.xlu2 %v352_v15  ;;  %p663_p4 = pnand %p662_p3, %p658_p13 }
  0x38   : > { %598 = vset.pattern.permute.xlu1 %v365_v16  ;;  %597 = vset.pattern.permute.xlu0 %v359_v17 }
  0x3c   : > { %232 = vadd.xlane.f32.xlu1 %v231_v22 }
  0x3d   : > { %220 = vadd.xlane.f32.xlu0 %v219_v23 }
  0x9f   : > { %v224_v28 = vpop.xlane.xlu1 %223 }
  0xa0   : > { %v212_v29 = vpop.xlane.xlu0 %211  ;;  %v238_v39 = vmul.f32 0.00390625, %v224_v28 }
  0xa1   : > { %v218_v30 = vpop.xlane.xlu2 %217  ;;  %v234_v40 = vmul.f32 0.00390625, %v212_v29 }
  0xa2   : > { %v269_v45 = vperm.slane %v238_v39, %v255_v32  ;;  %v236_v46 = vmul.f32 0.00390625, %v218_v30 }
  0xa3   : > { %v256_v48 = vperm.slane %v234_v40, %v255_v32 }
  0xa4   : > { %v262_v56 = vperm.slane %v236_v46, %v261_v43 }
  0xa7   : > { %v227_v33 = vpop.xlane.xlu1 %226 }
  0xa8   : > { %v239_v35 = vmul.f32 0.00390625, %v227_v33  ;;  %v215_v36 = vpop.xlane.xlu0 %214 }
  0xa9   : > { %v230_v37 = vpop.xlane.xlu2 %229  ;;  %v235_v38 = vmul.f32 0.00390625, %v215_v36 }
  0xaa   : > { %v240_v41 = vmul.f32 0.00390625, %v230_v37  ;;  %v270_v42 = vperm.slane %v239_v35, %v257_v34  ;;  %v371_v37 = vadd.s32 24, %v352_v15 }
  0xab   : > { %v258_v44 = vperm.slane %v235_v38, %v257_v34 }
  0xac   : > { %v272_v49 = vperm.slane %v240_v41, %v261_v43  ;;  %v271_v51 = vsel %vm259_vm0, %v270_v42, %v269_v45 }
  0xad   : > { %v260_v54 = vsel %vm259_vm0, %v258_v44, %v256_v48 }
  0xae   : > { %v273_v59 = vsel %vm263_vm1, %v272_v49, %v271_v51  ;;  %v264_v60 = vsel %vm263_vm1, %v262_v56, %v260_v54 }
  0xaf   : > { %v233_v50 = vpop.xlane.xlu1 %232 }
  0xb0   : > { %v241_v52 = vmul.f32 0.00390625, %v233_v50  ;;  %v221_v53 = vpop.xlane.xlu0 %220 }
  0xb1   : > { %v237_v55 = vmul.f32 0.00390625, %v221_v53 }
  0xb2   : > { %v274_v57 = vperm.slane %v241_v52, %v265_v47 }
  0xb3   : > { %v266_v58 = vperm.slane %v237_v55, %v265_v47 }
  0xb4   : > { %v275_v61 = vsel %vm267_vm2, %v274_v57, %v273_v59 }
  0xb5   : > { %v268_v62 = vsel %vm267_vm2, %v266_v58, %v264_v60 }
  0xb6   : > { %v277_v63 = vsel %vm276_vm3, %v275_v61, %v268_v62 }
  0xb7   : > { %532 = vmatmul.msk.f32.vlgmr.msra.gmra.mxu0 %vm278_vm4, %v277_v63 }
 0x134   : > { %v298_v7 = vpop.f32.mrf.mxu0 }
 0x135   : > { %v301_v8 = vmax.f32 %v298_v7, 0.0 }
 0x137   : > { %534 = vmatmul.msk.f32.vlgmr.msra.gmra.mxu1 %vm303_vm6, %v301_v8 }
 0x1b4   : > { %v328_v22 = vpop.f32.mrf.mxu1 }
 0x1b5   : > { %v535_v23 = vmul.f32 -1.442695, %v328_v22 }
 0x1b7   : > { %605 = vpow2.f32 %v535_v23 }
 0x1bd   : > { %v606_v24 = vpop.eup %605 }
 0x1be   : > { %v334_v25 = vadd.f32 1.0, %v606_v24 }
 0x1c0   : > { %607 = vrcp.f32 %v334_v25  ;;  %v346_v29 = vand.u32 2147483648, %v334_v25  ;;  %v344_v32 = vand.u32 2147483647, %v334_v25  ;;  %vm340_vm8 = vweird.f32 %v334_v25 }
 0x1c2   : > { %v347_v31 = vor.u32 1.1754944e-38, %v346_v29  ;;  %vm345_vm10 = vcmp.eq.f32.partialorder %v344_v32, 8.507059e+37 }
 0x1c6   : > { %v608_v26 = vpop.eup %607 }
 0x1c7   : > { %v336_v27 = vmul.f32 %v608_v26, %v334_v25  ;;  %vm341_vm7 = vweird.f32 %v608_v26 }
 0x1c8   : > { %vm342_vm9 = vmor %vm340_vm8, %vm341_vm7 }
 0x1c9   : > { %v337_v28 = vsub.f32 1.0, %v336_v27 }
 0x1cb   : > { %v338_v30 = vmul.f32 %v608_v26, %v337_v28 }
 0x1cd   : > { %v339_v33 = vadd.f32 %v608_v26, %v338_v30 }
 0x1cf   : > { %v343_v34 = vsel %vm342_vm9, %v608_v26, %v339_v33 }
 0x1d0   : > { %v348_v35 = vsel %vm345_vm10, %v347_v31, %v343_v34 }
 0x1d1   : > { %v350_v36 = vperm.slane %v348_v35, 0  ;;  %v375_v38 = vperm.slane %v348_v35, 1 }
 0x1d3   : > { %367 = vperm.xlu1 %598, %v350_v36   ;;  %361 = vperm.xlu0 %597, %v350_v36  }
 0x1d4   : > { %355 = vperm.xlu2 %596, %v350_v36  }
 0x1db   : > { %601 = vset.pattern.permute.xlu1 %v359_v17  ;;  %604 = vset.pattern.permute.xlu0 %v371_v37 }
 0x1dc   : > { %599 = vset.pattern.permute.xlu2 %v371_v37 }
 0x1e3   : > { %386 = vperm.xlu1 %601, %v375_v38  }
 0x1e4   : > { %373 = vperm.xlu2 %599, %v350_v36  }
 0x1eb   : > { %603 = vset.pattern.permute.xlu1 %v371_v37 }
 0x1ec   : > { %600 = vset.pattern.permute.xlu2 %v352_v15 }
 0x1f3   : > { %398 = vperm.xlu1 %603, %v375_v38  }
 0x1f4   : > { %380 = vperm.xlu2 %600, %v375_v38  }
 0x1fc   : > { %602 = vset.pattern.permute.xlu2 %v365_v16 }
 0x204   : > { %392 = vperm.xlu2 %602, %v375_v38  }
 0x22e   : > { %v356_v39 = vpop.permute.xlu2 %355 }
 0x22f   : > { %v400_v40 = vmul.f32 %v356_v39, %v831_v2  ;;  %v401_v41 = vmul.f32 %v356_v39, %v835_v4 }
 0x231   : > { %416 = vst [vmem:[%s894_s22] sm:$0xff] %v400_v40 }
 0x232   : > { %417 = vst [vmem:[%s894_s22 + $0x8] sm:$0xff] %v401_v41 }
 0x23e   : > { %v374_v42 = vpop.permute.xlu2 %373 }
 0x23f   : > { %v406_v43 = vmul.f32 %v374_v42, %v867_v20  ;;  %v407_v2 = vmul.f32 %v374_v42, %v869_v21 }
 0x241   : > { %422 = vst [vmem:[%s894_s22 + $0x30] sm:$0xff] %v406_v43 }
 0x242   : > { %423 = vst [vmem:[%s894_s22 + $0x38] sm:$0xff] %v407_v2 }
 0x245   : > { %v368_v4 = vpop.permute.xlu1 %367  ;;  %v362_v44 = vpop.permute.xlu0 %361 }
 0x246   : > { %v404_v45 = vmul.f32 %v368_v4, %v837_v5  ;;  %v405_v46 = vmul.f32 %v368_v4, %v839_v6  ;;  %v402_v47 = vmul.f32 %v362_v44, %v849_v11  ;;  %v403_v48 = vmul.f32 %v362_v44, %v851_v12 }
 0x248   : > { %420 = vst [vmem:[%s894_s22 + $0x20] sm:$0xff] %v404_v45 }
 0x249   : > { %421 = vst [vmem:[%s894_s22 + $0x28] sm:$0xff] %v405_v46 }
 0x24a   : > { %418 = vst [vmem:[%s894_s22 + $0x10] sm:$0xff] %v402_v47 }
 0x24b   : > { %419 = vst [vmem:[%s894_s22 + $0x18] sm:$0xff] %v403_v48 }
 0x24e   : > { %v381_v20 = vpop.permute.xlu2 %380 }
 0x24f   : > { %v408_v21 = vmul.f32 %v381_v20, %v827_v0  ;;  %v409_v5 = vmul.f32 %v381_v20, %v829_v1 }
 0x251   : > { %424 = vst [vmem:[%s894_s22 + $0x40] sm:$0xff] %v408_v21 }
 0x252   : > { %425 = vst [vmem:[%s894_s22 + $0x48] sm:$0xff] %v409_v5 }
 0x255   : > { %v387_v6 = vpop.permute.xlu1 %386 }
 0x256   : > { %v410_v11 = vmul.f32 %v387_v6, %v845_v9  ;;  %v411_v49 = vmul.f32 %v387_v6, %v847_v10 }
 0x258   : > { %426 = vst [vmem:[%s894_s22 + $0x50] sm:$0xff] %v410_v11 }
 0x259   : > { %427 = vst [vmem:[%s894_s22 + $0x58] sm:$0xff] %v411_v49 }
 0x25e   : > { %v393_v12 = vpop.permute.xlu2 %392 }
 0x25f   : > { %v412_v50 = vmul.f32 %v393_v12, %v853_v13  ;;  %v413_v0 = vmul.f32 %v393_v12, %v855_v14 }
 0x261   : > { %428 = vst [vmem:[%s894_s22 + $0x60] sm:$0xff] %v412_v50 }
 0x262   : > { %429 = vst [vmem:[%s894_s22 + $0x68] sm:$0xff] %v413_v0 }
 0x265   : > { %v399_v1 = vpop.permute.xlu1 %398 }
 0x266   : > { %v414_v9 = vmul.f32 %v399_v1, %v863_v18  ;;  %v415_v10 = vmul.f32 %v399_v1, %v865_v19 }
 0x268   : > { %430 = vst [vmem:[%s894_s22 + $0x70] sm:$0xff] %v414_v9 }
 0x269   : > { %431 = vst [vmem:[%s894_s22 + $0x78] sm:$0xff] %v415_v10 }
 0x26a   : > { %666 = shalt.err (!%p663_p4)
}
 0x26b   : > { %s709_s29 = smov 256   ;;  %s710_s17 = smov 16  }
 0x26c   : > { %548 = dma.vmem_to_hbm [thread:$0]  (%p781_p11), %s447_s4, 2048, %s449_s6, %s433_s16, %s709_s29, %s709_s29, %s710_s17  }
 0x26d PF: > { %s463_s19 = sand.u32 1, %s693_s12   ;;  %p969_p7 = scmp.ge.s32.totalorder %s705_s15, 2 }
 0x26e   : > { %s464_s20 = scalar_lea.sflag [#allocation4], %s463_s19 }
 0x26f   : > { %p555_p5 = pnand %p969_p7, %p785_p12 }
 0x271   : > { %p556_p8 = pneg %p555_p5 }
 0x273   : > { %688 = dma.done.wait (%p556_p8), %s464_s20, 2048  }
 0x274   : > { %690 = vsyncadd (%p556_p8), %s464_s20, 4294965248  ;;  %p16_p10 = scmp.ge.s32.totalorder %s756_s18, 4   ;;  %s970_s12 = smov %s697_s13 }
 0x275   : > { %s971_s13 = smov %s701_s14  ;;  %s972_s14 = smov %s768_s21 }
 0x276   : > { %s973_s15 = smov %s756_s18  ;;  %18 = sbr.rel (!%p16_p10) target bundleno = 5 (0x5), region = 77 }
 0x27b   :  { %470 = vsyncpa [#allocation3], 1 }
 0x27c   :  { %472 = vsyncpa [#allocation3 + $0x1], 1 }
 0x27d   :  { %473 = vsyncpa [#allocation4], 1 }
 0x27e   :  { %475 = vsyncpa [#allocation4 + $0x1], 1 }

</bundles_post_ra>
